<compile_context>
chip_gen: v5e
topology: v5e:2x2
jax: 0.10.0
libtpu: 0.0.40
codegen_flags: <defaults>
</compile_context>

<pallas_src>
import functools

import jax
import jax.numpy as jnp
from jax.experimental import pallas as pl
from jax.experimental.pallas import tpu as pltpu


def _ce_label_smooth_kernel(x_ref, t_ref, out_ref, *, epsilon, num_classes,
                            batch, tile_b):
    # x_ref: (TB, C) f32 logits, t_ref: (TB, 1) i32 labels,
    # out_ref: (1, 8, 128) f32 per-tile partial (lane-dense store).
    i = pl.program_id(0)
    x = x_ref[...].astype(jnp.float32)                 # (TB, C)
    tb, c = x.shape

    labels = t_ref[...]                                # (TB, 1) i32

    # Validity mask for padded batch rows (they contribute 0 to the loss).
    row_ids = jax.lax.broadcasted_iota(jnp.int32, (tb, 1), 0) + i * tile_b
    valid = (row_ids < batch).astype(jnp.float32)      # (TB, 1)

    # --- log-softmax statistics (only `shifted` is (TB, C); rest are (TB,1)) --
    x_max = jnp.max(x, axis=-1, keepdims=True)                         # (TB, 1)
    shifted = x - x_max                                                # (TB, C)
    log_z = jnp.log(jnp.sum(jnp.exp(shifted), axis=-1, keepdims=True)) # (TB, 1)

    # Selected (label) logit via iota compare -> reduce (scatter_ equivalent).
    class_ids = jax.lax.broadcasted_iota(jnp.int32, (tb, c), 1)
    sel = jnp.sum(jnp.where(class_ids == labels, shifted, 0.0),
                  axis=-1, keepdims=True)                              # (TB, 1)
    row_sum = jnp.sum(shifted, axis=-1, keepdims=True)                 # (TB, 1)

    # per-row loss = -(1-eps)*logp[b,t_b] - (eps/C)*sum_c logp[b,c]
    per_row = (-(1.0 - epsilon) * (sel - log_z)
               - (epsilon / num_classes) * (row_sum - float(c) * log_z))

    partial = jnp.sum(per_row * valid) / jnp.float32(batch)

    # Lane-dense (8, 128) store of the per-tile partial (unmasked vst).
    out_ref[...] = jnp.full(out_ref.shape, partial, dtype=jnp.float32)


def cross_entropy_label_smooth(inputs, targets, *, num_classes, epsilon=0.1,
                               tile_b=None):
    """inputs: (B, num_classes) f32 logits; targets: (B,) int labels -> scalar f32."""
    B, C = inputs.shape
    assert C == num_classes

    # ---- choose a batch tile: keep double-buffered logits (2*TB*C*4 B) small
    # enough for the default scoped VMEM on every generation (v5e 16 MiB,
    # v6e 32 MiB, v7x 32 MiB scoped / 64 MiB physical).
    b_round8 = ((B + 7) // 8) * 8
    if tile_b is None:
        budget_bytes = 8 * 1024 * 1024
        tb = (budget_bytes // (2 * C * 4)) // 8 * 8
        tb = max(8, min(1024, tb))
    else:
        tb = max(8, (int(tile_b) // 8) * 8)
    tb = min(tb, b_round8)

    num_tiles = pl.cdiv(B, tb)
    b_pad = num_tiles * tb

    x = inputs.astype(jnp.float32)
    t = targets.astype(jnp.int32).reshape(B, 1)
    if b_pad != B:
        x = jnp.pad(x, ((0, b_pad - B), (0, 0)))
        t = jnp.pad(t, ((0, b_pad - B), (0, 0)))   # padded labels masked in-kernel

    kernel = functools.partial(
        _ce_label_smooth_kernel,
        epsilon=float(epsilon),
        num_classes=int(num_classes),
        batch=int(B),
        tile_b=int(tb),
    )

    partials = pl.pallas_call(
        kernel,
        out_shape=jax.ShapeDtypeStruct((num_tiles, 8, 128), jnp.float32),
        grid=(num_tiles,),
        in_specs=[
            pl.BlockSpec((tb, C), lambda i: (i, 0)),   # logits tile (pipelined)
            pl.BlockSpec((tb, 1), lambda i: (i, 0)),   # labels tile
        ],
        out_specs=pl.BlockSpec((1, 8, 128), lambda i: (i, 0, 0)),
        compiler_params=pltpu.CompilerParams(
            dimension_semantics=("parallel",),
        ),
        cost_estimate=pl.CostEstimate(
            flops=5 * b_pad * C,
            transcendentals=b_pad * C,
            bytes_accessed=4 * b_pad * C + 4 * b_pad + 4 * num_tiles * 8 * 128,
        ),
    )(x, t)

    # Each tile already divides by the true batch size; sum the partials.
    return jnp.sum(partials[:, 0, 0])


def _reference(inputs, targets, num_classes, epsilon=0.1):
    log_probs = jax.nn.log_softmax(inputs.astype(jnp.float32), axis=1)
    one_hot = jax.nn.one_hot(targets, num_classes, dtype=jnp.float32)
    smoothed = (1.0 - epsilon) * one_hot + epsilon / num_classes
    return (-smoothed * log_probs).mean(0).sum()


if __name__ == "__main__":
    key = jax.random.PRNGKey(0)
    k1, k2 = jax.random.split(key)

    batch = 12          # deliberately not a multiple of the tile -> exercises masking
    num_classes = 32
    epsilon = 0.1

    inputs = jax.random.normal(k1, (batch, num_classes), dtype=jnp.float32)
    targets = jax.random.randint(k2, (batch,), 0, num_classes, dtype=jnp.int32)

    ref = _reference(inputs, targets, num_classes, epsilon)

    # Multi-tile path (2 batch tiles of 8, 4 padded rows masked out).
    loss_tiled = cross_entropy_label_smooth(
        inputs, targets, num_classes=num_classes, epsilon=epsilon, tile_b=8)
    loss_tiled = jax.block_until_ready(loss_tiled)
    assert jnp.allclose(loss_tiled, ref, atol=1e-5, rtol=1e-5), (loss_tiled, ref)

    # Default (auto) tile path.
    loss_auto = cross_entropy_label_smooth(
        inputs, targets, num_classes=num_classes, epsilon=epsilon)
    loss_auto = jax.block_until_ready(loss_auto)
    assert jnp.allclose(loss_auto, ref, atol=1e-5, rtol=1e-5), (loss_auto, ref)

    print("KERNEL_OK")
</pallas_src>

<mosaic_0001>
module attributes {stable_mosaic.version = 11 : i64} {
  func.func @_ce_label_smooth_kernel(%arg0: i32, %arg1: memref<8x32xf32, #tpu.memory_space<vmem>>, %arg2: memref<8x1xi32, #tpu.memory_space<vmem>>, %arg3: memref<1x8x128xf32, #tpu.memory_space<vmem>>) attributes {dimension_semantics = [#tpu.dimension_semantics<parallel>], iteration_bounds = array<i64: 2>, scalar_prefetch = 0 : i64, scratch_operands = 0 : i64, tpu.core_type = #tpu.core_type<tc>, window_params = [{transform_indices = @transform_0, window_bounds = array<i64: 8, 32>}, {transform_indices = @transform_1, window_bounds = array<i64: 8, 1>}, {transform_indices = @transform_2, window_bounds = array<i64: 1, 8, 128>}]} {
    %c0 = arith.constant 0 : index
    %c0_0 = arith.constant 0 : index
    %0 = vector.load %arg1[%c0, %c0_0] : memref<8x32xf32, #tpu.memory_space<vmem>>, vector<8x32xf32>
    %c0_1 = arith.constant 0 : index
    %c0_2 = arith.constant 0 : index
    %1 = vector.load %arg2[%c0_1, %c0_2] : memref<8x1xi32, #tpu.memory_space<vmem>>, vector<8x1xi32>
    %2 = tpu.iota {dimensions = array<i32: 0>} : vector<8x1xi32>
    %c8_i32 = arith.constant 8 : i32
    %3 = arith.muli %arg0, %c8_i32 : i32
    %4 = vector.broadcast %3 : i32 to vector<8x1xi32>
    %5 = arith.addi %2, %4 : vector<8x1xi32>
    %c12_i32 = arith.constant 12 : i32
    %6 = vector.broadcast %c12_i32 : i32 to vector<8x1xi32>
    %7 = arith.cmpi slt, %5, %6 : vector<8x1xi32>
    %8 = arith.extui %7 : vector<8x1xi1> to vector<8x1xi32>
    %9 = arith.sitofp %8 : vector<8x1xi32> to vector<8x1xf32>
    %cst = arith.constant dense<0xFF800000> : vector<8xf32>
    %10 = vector.multi_reduction <maximumf>, %0, %cst [1] : vector<8x32xf32> to vector<8xf32>
    %11 = vector.shape_cast %10 : vector<8xf32> to vector<8x1xf32>
    %12 = vector.broadcast %11 : vector<8x1xf32> to vector<8x32xf32>
    %13 = arith.subf %0, %12 : vector<8x32xf32>
    %14 = math.exp %13 : vector<8x32xf32>
    %cst_3 = arith.constant dense<0.000000e+00> : vector<8xf32>
    %15 = vector.multi_reduction <add>, %14, %cst_3 [1] : vector<8x32xf32> to vector<8xf32>
    %16 = vector.shape_cast %15 : vector<8xf32> to vector<8x1xf32>
    %17 = math.log %16 : vector<8x1xf32>
    %18 = tpu.iota {dimensions = array<i32: 1>} : vector<8x32xi32>
    %19 = vector.broadcast %1 : vector<8x1xi32> to vector<8x32xi32>
    %20 = arith.cmpi eq, %18, %19 : vector<8x32xi32>
    %cst_4 = arith.constant 0.000000e+00 : f32
    %21 = vector.broadcast %cst_4 : f32 to vector<8x32xf32>
    %22 = arith.select %20, %13, %21 : vector<8x32xi1>, vector<8x32xf32>
    %cst_5 = arith.constant dense<0.000000e+00> : vector<8xf32>
    %23 = vector.multi_reduction <add>, %22, %cst_5 [1] : vector<8x32xf32> to vector<8xf32>
    %24 = vector.shape_cast %23 : vector<8xf32> to vector<8x1xf32>
    %cst_6 = arith.constant dense<0.000000e+00> : vector<8xf32>
    %25 = vector.multi_reduction <add>, %13, %cst_6 [1] : vector<8x32xf32> to vector<8xf32>
    %26 = vector.shape_cast %25 : vector<8xf32> to vector<8x1xf32>
    %27 = arith.subf %24, %17 : vector<8x1xf32>
    %cst_7 = arith.constant -0.899999976 : f32
    %28 = vector.broadcast %cst_7 : f32 to vector<8x1xf32>
    %29 = arith.mulf %28, %27 : vector<8x1xf32>
    %cst_8 = arith.constant 3.200000e+01 : f32
    %30 = vector.broadcast %cst_8 : f32 to vector<8x1xf32>
    %31 = arith.mulf %30, %17 : vector<8x1xf32>
    %32 = arith.subf %26, %31 : vector<8x1xf32>
    %cst_9 = arith.constant 3.125000e-03 : f32
    %33 = vector.broadcast %cst_9 : f32 to vector<8x1xf32>
    %34 = arith.mulf %33, %32 : vector<8x1xf32>
    %35 = arith.subf %29, %34 : vector<8x1xf32>
    %36 = arith.mulf %35, %9 : vector<8x1xf32>
    %37 = vector.shape_cast %36 : vector<8x1xf32> to vector<1x8x1xf32>
    %cst_10 = arith.constant dense<0.000000e+00> : vector<1xf32>
    %38 = vector.multi_reduction <add>, %37, %cst_10 [1, 2] : vector<1x8x1xf32> to vector<1xf32>
    %39 = vector.shape_cast %38 : vector<1xf32> to vector<1x1x1xf32>
    %40 = vector.extract %39[0, 0, 0] : f32 from vector<1x1x1xf32>
    %cst_11 = arith.constant 1.200000e+01 : f32
    %41 = arith.divf %40, %cst_11 : f32
    %42 = vector.broadcast %41 : f32 to vector<1x8x128xf32>
    %c0_12 = arith.constant 0 : index
    %c0_13 = arith.constant 0 : index
    %c0_14 = arith.constant 0 : index
    %43 = vector.load %arg3[%c0_12, %c0_13, %c0_14] : memref<1x8x128xf32, #tpu.memory_space<vmem>>, vector<1x8x128xf32>
    tpu.vector_store %arg3[%c0_12, %c0_13, %c0_14], %42 {strides = array<i32>} : memref<1x8x128xf32, #tpu.memory_space<vmem>>, vector<1x8x128xf32>,
    return
  }
  func.func @transform_0(%arg0: i32) -> (i32, i32) {
    %c0_i32 = arith.constant 0 : i32
    %c0_i32_0 = arith.constant 0 : i32
    return %arg0, %c0_i32 : i32, i32
  }
  func.func @transform_1(%arg0: i32) -> (i32, i32) {
    %c0_i32 = arith.constant 0 : i32
    %c0_i32_0 = arith.constant 0 : i32
    return %arg0, %c0_i32 : i32, i32
  }
  func.func @transform_2(%arg0: i32) -> (i32, i32, i32) {
    %c0_i32 = arith.constant 0 : i32
    %c0_i32_0 = arith.constant 0 : i32
    %c0_i32_1 = arith.constant 0 : i32
    return %arg0, %c0_i32, %c0_i32_0 : i32, i32, i32
  }
}

</mosaic_0001>

<bundles_post_ra>
// kernel: tpu_custom_call.1
= control target key start
LH: loop header
LB: loop body
LE: loop exit
PB: predicated region body
PF: predicated region fallthrough
CT: control target
= control target key end

     0   :  { %7 = vsyncpa [#allocation3], 0  ;;  %s551_s0 = inlined_call_operand.vmem [shape: f32[16,32], index: 0, kind: input, shape index: {}]   ;;  %s552_s1 = inlined_call_operand.vmem [shape: s32[16,1], index: 1, kind: input, shape index: {}]   ;;  %s553_s2 = inlined_call_operand.hbm [shape: f32[2,8,128], index: 2, kind: output, shape index: {}]  }
   0x1   :  { %9 = vsyncpa [#allocation3 + $0x1], 0  ;;  %s455_s9 = smov 0   ;;  %s457_s10 = smov 0  }
   0x2   :  { %s459_s11 = smov 0   ;;  %s461_s12 = smov 0  }
   0x3 LB: > { %s476_s13 = sadd.s32 4294967295, %s435_s12   ;;  %s307_s14 = sadd.s32 4294967294, %s435_s12   ;;  %s435_s12 = sphi %s461_s12, %s559_s12   ;;  %s431_s11 = sphi %s459_s11, %s558_s11   ;;  %s427_s10 = sphi %s457_s10, %s557_s10   ;;  %s423_s9 = sphi %s455_s9, %s556_s9  }
   0x4   : > { %s480_s15 = sadd.s32 1, %s435_s12   ;;  %s74_s16 = sadd.s32 1, %s431_s11 }
   0x5   : > { %s71_s17 = ssub.s32 %s435_s12, %s480_s15  ;;  %p84_p0 = scmp.ne.s32.totalorder %s431_s11, %s427_s10 }
   0x6   : > { %p72_p1 = scmp.eq.s32.totalorder %s71_s17, 0  ;;  %p85_p2 = scmp.eq.s32.totalorder %s476_s13, 1 }
   0x7   : > { %p90_p3 = scmp.ne.s32.totalorder %s427_s10, %s423_s9  ;;  %p91_p4 = scmp.eq.s32.totalorder %s307_s14, 1 }
   0x8   : > { %s491_s18 = scalar_select %p72_p1, %s431_s11, %s74_s16  }
   0x9   : > { %p493_p5 = por %p85_p2, %p84_p0  ;;  %p497_p6 = por %p91_p4, %p90_p3 }
   0xa   : > { %p310_p7 = scmp.ge.s32.totalorder %s435_s12, 1  ;;  %p123_p8 = scmp.lt.s32.totalorder %s435_s12, 3 }
   0xc   : > { %p124_p9 = pnand %p310_p7, %p123_p8 }
   0xd   : > { %p148_p10 = scmp.lt.s32.totalorder (!%p124_p9), %s476_s13, 1  ;;  %s314_s29 = sshll.u32 (!%p124_p9), %s476_s13, 3 }
   0xe   : > { %127 = sbr.rel (%p124_p9) target bundleno = 474 (0x1da), region = 28  ;;  %s145_s30 = sand.u32 (!%p124_p9), 1, %s427_s10  }
   0xf   : > { %s311_s3 = sshll.u32 (!%p124_p9), %s145_s30, 3  ;;  %s231_s6 = scalar_lea.hbm (!%p124_p9), %s553_s2, %s314_s29 }
  0x10   : > { %s147_s7 = scalar_lea.vmem (!%p124_p9), [#allocation2], %s311_s3  ;;  %s235_s16 = sshll.u32 (!%p124_p9), %s231_s6, 4  ;;  %s236_s16 = int_to_ptr.hbm [resolvable:$true] %s235_s16 }
  0x11   : > { %s233_s8 = sshll.u32 (!%p124_p9), %s147_s7, 4  ;;  %s387_s23 = sshra.s32 (!%p124_p9), %s236_s16, 4  ;;  %s234_s8 = int_to_ptr.vmem [resolvable:$true] %s233_s8  ;;  %s388_s23 = int_to_ptr.hbm [resolvable:$true] %s387_s23 }
  0x12   : > { %s389_s24 = scalar_lea.hbm (!%p124_p9), %s388_s23, 8  ;;  %s393_s26 = scalar_lea.hbm (!%p124_p9), %s553_s2, 16 }
  0x13   : > { %v437_v0 = vmov 0   ;;  %s149_s21 = scalar_select %p148_p10, %s476_s13, 1  ;;  %vm166_vm0 = vcmask 261120   ;;  %v158_v10 = vlaneseq  ;;  %v161_v17 = vstv %s314_s29 }
  0x14   : > { %366 = vset.pattern.permute.xlu0 %v437_v0  ;;  %v438_v28 = vmov 0.0   ;;  %vm198_vm3 = vcmask 7168   ;;  %v439_v33 = vmov 12.0   ;;  %p390_p11 = scmp.ne.s32.totalorder %s388_s23, %s389_s24  ;;  %p394_p0 = scmp.lt.s32.totalorder %s388_s23, %s553_s2 }
  0x15   : > { %s312_s22 = sshll.u32 %s149_s21, 3  ;;  %v179_v11 = vand.u32 127, %v158_v10  ;;  %v159_v16 = vshrl.u32 %v158_v10, 7  ;;  %p395_p1 = scmp.lt.s32.totalorder %s393_s26, %s389_s24 }
  0x16   : > { %s151_s25 = scalar_lea.vmem %s551_s0, %s312_s22  ;;  %s155_s28 = scalar_lea.vmem %s552_s1, %s312_s22 }
  0x17   : > { %v156_v1 = vld [vmem:[%s151_s25] sm:$0xff]  ;;  %v162_v20 = vadd.s32 %v161_v17, %v159_v16  ;;  %s221_s22 = scalar_lea.sflag [#allocation3], %s145_s30  ;;  %p391_p12 = pnand %p390_p11, %p493_p5 }
  0x18   : > { %v167_v2 = vsel %vm166_vm0, %v156_v1, -inf  ;;  %v157_v3 = vld [vmem:[%s155_s28] sm:$0xff]  ;;  %p396_p2 = por %p395_p1, %p394_p0 }
  0x19   : > { %168 = vmax.xlane.f32.xlu0 %v167_v2  ;;  %vm163_vm2 = vcmp.lt.s32.totalorder %v162_v20, 12  ;;  %p392_p13 = pneg %p391_p12 }
  0x1a   : > { %v315_v29 = vsel %vm163_vm2, 1.0, %v438_v28 }
  0x1b   : > { %p397_p3 = pnand %p396_p2, %p392_p13 }
  0x2d   : > { %181 = vperm.xlu0 %366, %v157_v3  }
  0x8c   : > { %v169_v4 = vpop.xlane.xlu0 %168 }
  0x8d   : > { %v170_v5 = vsub.f32 %v156_v1, %v169_v4 }
  0x8f   : > { %v171_v6 = vmul.f32 1.442695, %v170_v5  ;;  %v188_v7 = vsel %vm166_vm0, %v170_v5, 0.0 }
  0x90   : > { %189 = vadd.xlane.f32.xlu2 %v188_v7 }
  0x91   : > { %367 = vpow2.f32 %v171_v6 }
  0x97   : > { %v368_v8 = vpop.eup %367 }
  0x98   : > { %v173_v9 = vsel %vm166_vm0, %v368_v8, 0.0 }
  0x99   : > { %174 = vadd.xlane.f32.xlu1 %v173_v9 }
  0x9f   : > { %v182_v12 = vpop.permute.xlu0 %181 }
  0xa0   : > { %vm183_vm1 = vcmp.eq.s32.totalorder %v179_v11, %v182_v12 }
  0xa1   : > { %v184_v13 = vsel %vm183_vm1, %v170_v5, 0.0 }
  0xa2   : > { %v185_v14 = vsel %vm166_vm0, %v184_v13, 0.0 }
  0xa3   : > { %186 = vadd.xlane.f32.xlu1 %v185_v14 }
 0x103   : > { %v190_v23 = vpop.xlane.xlu2 %189 }
 0x10c   : > { %v175_v15 = vpop.xlane.xlu1 %174 }
 0x10d   : > { %369 = vlog2.f32 %v175_v15 }
 0x10e   : > { %371 = vrcp.f32 %v439_v33 }
 0x113   : > { %v370_v18 = vpop.eup %369 }
 0x114   : > { %v177_v19 = vmul.f32 0.6931472, %v370_v18  ;;  %v372_v34 = vpop.eup %371 }
 0x115   : > { %v210_v35 = vmul.f32 12.0, %v372_v34  ;;  %vm214_vm4 = vweird.f32 %v372_v34 }
 0x116   : > { %v193_v21 = vmul.f32 32.0, %v177_v19  ;;  %v187_v22 = vpop.xlane.xlu1 %186 }
 0x117   : > { %v191_v24 = vsub.f32 %v187_v22, %v177_v19  ;;  %v211_v36 = vsub.f32 1.0, %v210_v35 }
 0x118   : > { %v194_v25 = vsub.f32 %v190_v23, %v193_v21 }
 0x119   : > { %v192_v26 = vmul.f32 -0.9, %v191_v24  ;;  %v212_v40 = vmul.f32 %v372_v34, %v211_v36 }
 0x11a   : > { %v195_v27 = vmul.f32 0.003125, %v194_v25 }
 0x11b   : > { %v213_v43 = vadd.f32 %v372_v34, %v212_v40 }
 0x11c   : > { %v196_v30 = vsub.f32 %v192_v26, %v195_v27 }
 0x11d   : > { %v215_v46 = vsel %vm214_vm4, %v372_v34, %v213_v43 }
 0x11e   : > { %v197_v31 = vmul.f32 %v315_v29, %v196_v30 }
 0x120   : > { %v199_v32 = vsel %vm198_vm3, %v197_v31, 0.0 }
 0x121   : > { %200 = vadd.xlane.f32.xlu2 %v199_v32 }
 0x194   : > { %v201_v37 = vpop.xlane.xlu2 %200 }
 0x195   : > { %v202_v38 = vrot.slane %v201_v37, 4 }
 0x197   : > { %v203_v39 = vadd.f32 %v202_v38, %v201_v37 }
 0x199   : > { %v204_v41 = vrot.slane %v203_v39, 2 }
 0x19b   : > { %v205_v42 = vadd.f32 %v204_v41, %v203_v39 }
 0x19d   : > { %v206_v44 = vrot.slane %v205_v42, 1 }
 0x19f   : > { %v207_v45 = vadd.f32 %v206_v44, %v205_v42 }
 0x1a1   : > { %320 = vpush %v207_v45 }
 0x1a2   : > { %322 = vpush %v215_v46 }
 0x1d2   : > { %s321_s14 = spop %320 }
 0x1d3   : > { %s323_s17 = spop %322 }
 0x1d4   : > { %s217_s21 = smul.f32 %s323_s17, %s321_s14 }
 0x1d6   : > { %v218_v47 = vstv %s217_s21 }
 0x1d7   : > { %219 = vst [vmem:[%s147_s7] sm:$0xff] %v218_v47 }
 0x1d8   : > { %400 = shalt.err (!%p397_p3)
}
 0x1d9   : > { %324 = dma.vmem_to_hbm [thread:$0]  (%p493_p5), %s234_s8, 128, %s236_s16, %s221_s22  }
 0x1da PF: > { %p330_p4 = scmp.ge.s32.totalorder %s435_s12, 2  ;;  %s247_s29 = sand.u32 1, %s423_s9  }
 0x1db   : > { %s248_s30 = scalar_lea.sflag [#allocation3], %s247_s29 }
 0x1dc   : > { %p327_p7 = pnand %p330_p4, %p497_p6 }
 0x1de   : > { %p328_p8 = pneg %p327_p7 }
 0x1e0   : > { %418 = dma.done.wait (%p328_p8), %s248_s30, 128  }
 0x1e1   : > { %420 = vsyncadd (%p328_p8), %s248_s30, 4294967168  ;;  %p12_p9 = scmp.ge.s32.totalorder %s480_s15, 4   ;;  %s556_s9 = smov %s427_s10 }
 0x1e2   : > { %s557_s10 = smov %s431_s11  ;;  %s558_s11 = smov %s491_s18 }
 0x1e3   : > { %s559_s12 = smov %s480_s15  ;;  %14 = sbr.rel (!%p12_p9) target bundleno = 3 (0x3), region = 66 }
 0x1e8   :  { %254 = vsyncpa [#allocation3], 1 }
 0x1e9   :  { %256 = vsyncpa [#allocation3 + $0x1], 1 }

</bundles_post_ra>
